<compile_context>
chip_gen: v7x
topology: tpu7x:2x2x1
jax: 0.10.0
libtpu: 0.0.40
codegen_flags: <defaults>
</compile_context>

<pallas_src>
import functools

import jax
import jax.numpy as jnp
from jax.experimental import pallas as pl
from jax.experimental.pallas import tpu as pltpu


def _round_up(x, m):
    return ((x + m - 1) // m) * m


def siamese_fc_kernel(x1_ref, x2_ref,
                      w1a_ref, w1b_ref, b1_ref,
                      w2_ref, b2_ref,
                      w3_ref, b3_ref,
                      out_ref):
    # fc[0]: Linear(2E -> 128) on concat(x1, x2); concat folded into a split
    # matmul. bf16 operands, f32 accumulation on the MXU.
    h1 = (jnp.dot(x1_ref[...], w1a_ref[...], preferred_element_type=jnp.float32)
          + jnp.dot(x2_ref[...], w1b_ref[...], preferred_element_type=jnp.float32)
          + b1_ref[...])
    h1 = jnp.maximum(h1, 0.0)                                   # fc[1]: ReLU (f32)

    # fc[2]: Linear(128 -> 64), f32.
    h2 = jnp.dot(h1, w2_ref[...], preferred_element_type=jnp.float32) + b2_ref[...]
    h2 = jnp.maximum(h2, 0.0)                                   # fc[3]: ReLU

    # fc[4]: Linear(64 -> 1) as VPU multiply + XLU lane reduction
    # (N=1 matmul would light up 1/256 of the MXU and stall its result FIFO).
    h3 = jnp.sum(h2 * w3_ref[...], axis=-1, keepdims=True) + b3_ref[...]

    # fc[5]: Sigmoid — exp and reciprocal both land on the otherwise-idle EUP.
    out_ref[...] = pl.reciprocal(1.0 + jnp.exp(-h3), approx=True).astype(out_ref.dtype)


def prepare_fc_params(params, embedding_size):
    """One-time prep (hoisted out of the per-call path): split W1 for the fused
    concat, cast first-layer weights to bf16, reshape biases / W3 into rows."""
    w1, b1, w2, b2, w3, b3 = params
    E = embedding_size
    assert w1.shape == (2 * E, 128)
    return (
        w1[:E].astype(jnp.bfloat16),                 # w1a: (E, 128)
        w1[E:].astype(jnp.bfloat16),                 # w1b: (E, 128)
        b1.reshape(1, 128).astype(jnp.float32),      # b1 : (1, 128)
        w2.astype(jnp.float32),                      # w2 : (128, 64)
        b2.reshape(1, 64).astype(jnp.float32),       # b2 : (1, 64)
        w3.reshape(1, 64).astype(jnp.float32),       # w3 : (1, 64)  (row vector)
        b3.reshape(1, 1).astype(jnp.float32),        # b3 : (1, 1)
    )


def default_tile_b():
    """Generation-aware batch tile: v5e/v6e have 128 MiB VMEM, v7x only 64."""
    try:
        kind = jax.devices()[0].device_kind.lower()
    except Exception:
        return 1024
    if "v5" in kind or "v6" in kind:
        return 2048
    return 1024  # v7x & unknown: keep double-buffered inputs well under 64 MiB


@functools.partial(jax.jit, static_argnames=("tile_b",))
def siamese_forward(img1, img2, prepared, tile_b=1024):
    """img1, img2: (B, E) float32 embeddings. Returns (B, 1) float32 in (0,1)."""
    B, E = img1.shape
    w1a, w1b, b1, w2, b2, w3r, b3 = prepared

    # bf16 activations for the dominant first matmul (halves input DMA traffic).
    x1 = img1.astype(jnp.bfloat16)
    x2 = img2.astype(jnp.bfloat16)

    tb = min(tile_b, _round_up(B, 8))
    grid = (pl.cdiv(B, tb),)

    x_spec = pl.BlockSpec((tb, E), lambda i: (i, 0))
    const = lambda arr: pl.BlockSpec(arr.shape, lambda i: (0, 0))  # resident weights

    return pl.pallas_call(
        siamese_fc_kernel,
        out_shape=jax.ShapeDtypeStruct((B, 1), jnp.float32),
        grid=grid,
        in_specs=[x_spec, x_spec,
                  const(w1a), const(w1b), const(b1),
                  const(w2), const(b2),
                  const(w3r), const(b3)],
        out_specs=pl.BlockSpec((tb, 1), lambda i: (i, 0)),
        compiler_params=pltpu.CompilerParams(
            dimension_semantics=("parallel",),
            vmem_limit_bytes=64 * 1024 * 1024,
        ),
    )(x1, x2, w1a, w1b, b1, w2, b2, w3r, b3)


def init_fc_params(key, embedding_size=512):
    """Deterministic PyTorch-style init: U(-1/sqrt(fan_in), 1/sqrt(fan_in)).

    Weights are stored as (in_features, out_features) — transposed vs. torch.
    """
    dims = [(2 * embedding_size, 128), (128, 64), (64, 1)]
    params = []
    for (fan_in, fan_out) in dims:
        key, kw, kb = jax.random.split(key, 3)
        bound = 1.0 / jnp.sqrt(jnp.float32(fan_in))
        w = jax.random.uniform(kw, (fan_in, fan_out), jnp.float32, -bound, bound)
        b = jax.random.uniform(kb, (fan_out,), jnp.float32, -bound, bound)
        params += [w, b]
    # TODO(synk): shared_nn parameters exist in __init__ but are unused in
    # forward; they are intentionally not materialized here.
    return tuple(params)


if __name__ == "__main__":
    EMBEDDING_SIZE = 512
    BATCH = 2

    key = jax.random.PRNGKey(0)
    k1, k2, kp = jax.random.split(key, 3)
    img1 = jax.random.normal(k1, (BATCH, EMBEDDING_SIZE), jnp.float32)
    img2 = jax.random.normal(k2, (BATCH, EMBEDDING_SIZE), jnp.float32)
    params = init_fc_params(kp, EMBEDDING_SIZE)
    prepared = prepare_fc_params(params, EMBEDDING_SIZE)
    tile_b = default_tile_b()

    def reference(a, b):
        w1, b1, w2, b2, w3, b3 = params
        cat = jnp.concatenate([a, b], axis=1)
        r = jnp.maximum(cat @ w1 + b1, 0.0)
        r = jnp.maximum(r @ w2 + b2, 0.0)
        return jax.nn.sigmoid(r @ w3 + b3)

    # Small spec-sized run (B=2).
    out = jax.block_until_ready(siamese_forward(img1, img2, prepared, tile_b=tile_b))
    ref = reference(img1, img2)
    assert out.shape == (BATCH, 1)
    # bf16 first-layer matmul + approx reciprocal -> loose absolute tolerance.
    assert jnp.allclose(out, ref, atol=2e-2, rtol=0.0), float(jnp.max(jnp.abs(out - ref)))

    # Larger run exercising the multi-tile grid with a partial last tile.
    B2 = 1280
    k3, k4 = jax.random.split(k2)
    big1 = jax.random.normal(k3, (B2, EMBEDDING_SIZE), jnp.float32)
    big2 = jax.random.normal(k4, (B2, EMBEDDING_SIZE), jnp.float32)
    out2 = jax.block_until_ready(siamese_forward(big1, big2, prepared, tile_b=512))
    ref2 = reference(big1, big2)
    assert out2.shape == (B2, 1)
    assert jnp.allclose(out2, ref2, atol=2e-2, rtol=0.0), float(jnp.max(jnp.abs(out2 - ref2)))

    print("KERNEL_OK")
</pallas_src>

<mosaic_0001>
module attributes {stable_mosaic.version = 11 : i64} {
  func.func @siamese_fc_kernel(%arg0: i32, %arg1: memref<8x512xbf16, #tpu.memory_space<vmem>>, %arg2: memref<8x512xbf16, #tpu.memory_space<vmem>>, %arg3: memref<512x128xbf16, #tpu.memory_space<vmem>>, %arg4: memref<512x128xbf16, #tpu.memory_space<vmem>>, %arg5: memref<1x128xf32, #tpu.memory_space<vmem>>, %arg6: memref<128x64xf32, #tpu.memory_space<vmem>>, %arg7: memref<1x64xf32, #tpu.memory_space<vmem>>, %arg8: memref<1x64xf32, #tpu.memory_space<vmem>>, %arg9: memref<1x1xf32, #tpu.memory_space<vmem>>, %arg10: memref<8x1xf32, #tpu.memory_space<vmem>>) attributes {dimension_semantics = [#tpu.dimension_semantics<parallel>], iteration_bounds = array<i64: 1>, scalar_prefetch = 0 : i64, scratch_operands = 0 : i64, tpu.core_type = #tpu.core_type<tc>, window_params = [{transform_indices = @transform_0, window_bounds = array<i64: 8, 512>}, {transform_indices = @transform_1, window_bounds = array<i64: 8, 512>}, {pipeline_mode = #tpu.pipeline_mode<synchronous>, transform_indices = @transform_2, window_bounds = array<i64: 512, 128>}, {pipeline_mode = #tpu.pipeline_mode<synchronous>, transform_indices = @transform_3, window_bounds = array<i64: 512, 128>}, {pipeline_mode = #tpu.pipeline_mode<synchronous>, transform_indices = @transform_4, window_bounds = array<i64: 1, 128>}, {pipeline_mode = #tpu.pipeline_mode<synchronous>, transform_indices = @transform_5, window_bounds = array<i64: 128, 64>}, {pipeline_mode = #tpu.pipeline_mode<synchronous>, transform_indices = @transform_6, window_bounds = array<i64: 1, 64>}, {pipeline_mode = #tpu.pipeline_mode<synchronous>, transform_indices = @transform_7, window_bounds = array<i64: 1, 64>}, {pipeline_mode = #tpu.pipeline_mode<synchronous>, transform_indices = @transform_8, window_bounds = array<i64: 1, 1>}, {transform_indices = @transform_9, window_bounds = array<i64: 8, 1>}]} {
    %c0 = arith.constant 0 : index
    %c0_0 = arith.constant 0 : index
    %0 = vector.load %arg1[%c0, %c0_0] : memref<8x512xbf16, #tpu.memory_space<vmem>>, vector<8x512xbf16>
    %c0_1 = arith.constant 0 : index
    %c0_2 = arith.constant 0 : index
    %1 = vector.load %arg3[%c0_1, %c0_2] : memref<512x128xbf16, #tpu.memory_space<vmem>>, vector<512x128xbf16>
    %cst = arith.constant dense<0.000000e+00> : vector<8x128xf32>
    %2 = tpu.matmul %0, %1, %cst {dimension_numbers = #tpu.dot_dimension_numbers<[1], [0], [0], [1], [0, 0, 1, 1], [], []>} : vector<8x512xbf16>, vector<512x128xbf16>, vector<8x128xf32> -> vector<8x128xf32>
    %c0_3 = arith.constant 0 : index
    %c0_4 = arith.constant 0 : index
    %3 = vector.load %arg2[%c0_3, %c0_4] : memref<8x512xbf16, #tpu.memory_space<vmem>>, vector<8x512xbf16>
    %c0_5 = arith.constant 0 : index
    %c0_6 = arith.constant 0 : index
    %4 = vector.load %arg4[%c0_5, %c0_6] : memref<512x128xbf16, #tpu.memory_space<vmem>>, vector<512x128xbf16>
    %cst_7 = arith.constant dense<0.000000e+00> : vector<8x128xf32>
    %5 = tpu.matmul %3, %4, %cst_7 {dimension_numbers = #tpu.dot_dimension_numbers<[1], [0], [0], [1], [0, 0, 1, 1], [], []>} : vector<8x512xbf16>, vector<512x128xbf16>, vector<8x128xf32> -> vector<8x128xf32>
    %6 = arith.addf %2, %5 : vector<8x128xf32>
    %c0_8 = arith.constant 0 : index
    %c0_9 = arith.constant 0 : index
    %7 = vector.load %arg5[%c0_8, %c0_9] : memref<1x128xf32, #tpu.memory_space<vmem>>, vector<1x128xf32>
    %8 = vector.broadcast %7 : vector<1x128xf32> to vector<8x128xf32>
    %9 = arith.addf %6, %8 : vector<8x128xf32>
    %cst_10 = arith.constant 0.000000e+00 : f32
    %10 = vector.broadcast %cst_10 : f32 to vector<8x128xf32>
    %11 = arith.maximumf %9, %10 : vector<8x128xf32>
    %c0_11 = arith.constant 0 : index
    %c0_12 = arith.constant 0 : index
    %12 = vector.load %arg6[%c0_11, %c0_12] : memref<128x64xf32, #tpu.memory_space<vmem>>, vector<128x64xf32>
    %cst_13 = arith.constant dense<0.000000e+00> : vector<8x64xf32>
    %13 = tpu.matmul %11, %12, %cst_13 {dimension_numbers = #tpu.dot_dimension_numbers<[1], [0], [0], [1], [0, 0, 1, 1], [], []>} : vector<8x128xf32>, vector<128x64xf32>, vector<8x64xf32> -> vector<8x64xf32>
    %c0_14 = arith.constant 0 : index
    %c0_15 = arith.constant 0 : index
    %14 = vector.load %arg7[%c0_14, %c0_15] : memref<1x64xf32, #tpu.memory_space<vmem>>, vector<1x64xf32>
    %15 = vector.broadcast %14 : vector<1x64xf32> to vector<8x64xf32>
    %16 = arith.addf %13, %15 : vector<8x64xf32>
    %cst_16 = arith.constant 0.000000e+00 : f32
    %17 = vector.broadcast %cst_16 : f32 to vector<8x64xf32>
    %18 = arith.maximumf %16, %17 : vector<8x64xf32>
    %c0_17 = arith.constant 0 : index
    %c0_18 = arith.constant 0 : index
    %19 = vector.load %arg8[%c0_17, %c0_18] : memref<1x64xf32, #tpu.memory_space<vmem>>, vector<1x64xf32>
    %20 = vector.broadcast %19 : vector<1x64xf32> to vector<8x64xf32>
    %21 = arith.mulf %18, %20 : vector<8x64xf32>
    %cst_19 = arith.constant dense<0.000000e+00> : vector<8xf32>
    %22 = vector.multi_reduction <add>, %21, %cst_19 [1] : vector<8x64xf32> to vector<8xf32>
    %23 = vector.shape_cast %22 : vector<8xf32> to vector<8x1xf32>
    %c0_20 = arith.constant 0 : index
    %c0_21 = arith.constant 0 : index
    %24 = vector.load %arg9[%c0_20, %c0_21] : memref<1x1xf32, #tpu.memory_space<vmem>>, vector<1x1xf32>
    %25 = vector.broadcast %24 : vector<1x1xf32> to vector<8x1xf32>
    %26 = arith.addf %23, %25 : vector<8x1xf32>
    %cst_22 = arith.constant 0.000000e+00 : f32
    %27 = vector.broadcast %cst_22 : f32 to vector<8x1xf32>
    %28 = arith.subf %27, %26 : vector<8x1xf32>
    %29 = math.exp %28 : vector<8x1xf32>
    %cst_23 = arith.constant 1.000000e+00 : f32
    %30 = vector.broadcast %cst_23 : f32 to vector<8x1xf32>
    %31 = arith.addf %30, %29 : vector<8x1xf32>
    %32 = tpu.reciprocal %31 {approx = true} : vector<8x1xf32> -> vector<8x1xf32>
    %c0_24 = arith.constant 0 : index
    %c0_25 = arith.constant 0 : index
    %33 = vector.load %arg10[%c0_24, %c0_25] : memref<8x1xf32, #tpu.memory_space<vmem>>, vector<8x1xf32>
    tpu.vector_store %arg10[%c0_24, %c0_25], %32 {strides = array<i32>} : memref<8x1xf32, #tpu.memory_space<vmem>>, vector<8x1xf32>,
    return
  }
  func.func @transform_0(%arg0: i32) -> (i32, i32) {
    %c0_i32 = arith.constant 0 : i32
    %c0_i32_0 = arith.constant 0 : i32
    return %arg0, %c0_i32 : i32, i32
  }
  func.func @transform_1(%arg0: i32) -> (i32, i32) {
    %c0_i32 = arith.constant 0 : i32
    %c0_i32_0 = arith.constant 0 : i32
    return %arg0, %c0_i32 : i32, i32
  }
  func.func @transform_2(%arg0: i32) -> (i32, i32) {
    %c0_i32 = arith.constant 0 : i32
    %c0_i32_0 = arith.constant 0 : i32
    %c0_i32_1 = arith.constant 0 : i32
    return %c0_i32, %c0_i32_0 : i32, i32
  }
  func.func @transform_3(%arg0: i32) -> (i32, i32) {
    %c0_i32 = arith.constant 0 : i32
    %c0_i32_0 = arith.constant 0 : i32
    %c0_i32_1 = arith.constant 0 : i32
    return %c0_i32, %c0_i32_0 : i32, i32
  }
  func.func @transform_4(%arg0: i32) -> (i32, i32) {
    %c0_i32 = arith.constant 0 : i32
    %c0_i32_0 = arith.constant 0 : i32
    %c0_i32_1 = arith.constant 0 : i32
    return %c0_i32, %c0_i32_0 : i32, i32
  }
  func.func @transform_5(%arg0: i32) -> (i32, i32) {
    %c0_i32 = arith.constant 0 : i32
    %c0_i32_0 = arith.constant 0 : i32
    %c0_i32_1 = arith.constant 0 : i32
    return %c0_i32, %c0_i32_0 : i32, i32
  }
  func.func @transform_6(%arg0: i32) -> (i32, i32) {
    %c0_i32 = arith.constant 0 : i32
    %c0_i32_0 = arith.constant 0 : i32
    %c0_i32_1 = arith.constant 0 : i32
    return %c0_i32, %c0_i32_0 : i32, i32
  }
  func.func @transform_7(%arg0: i32) -> (i32, i32) {
    %c0_i32 = arith.constant 0 : i32
    %c0_i32_0 = arith.constant 0 : i32
    %c0_i32_1 = arith.constant 0 : i32
    return %c0_i32, %c0_i32_0 : i32, i32
  }
  func.func @transform_8(%arg0: i32) -> (i32, i32) {
    %c0_i32 = arith.constant 0 : i32
    %c0_i32_0 = arith.constant 0 : i32
    %c0_i32_1 = arith.constant 0 : i32
    return %c0_i32, %c0_i32_0 : i32, i32
  }
  func.func @transform_9(%arg0: i32) -> (i32, i32) {
    %c0_i32 = arith.constant 0 : i32
    %c0_i32_0 = arith.constant 0 : i32
    return %arg0, %c0_i32 : i32, i32
  }
}

</mosaic_0001>

<bundles_post_ra>
// kernel: siamese_forward.1
= control target key start
LH: loop header
LB: loop body
LE: loop exit
PB: predicated region body
PF: predicated region fallthrough
CT: control target
= control target key end

     0   :  { %s1796_s0 = inlined_call_operand.hbm [shape: bf16[2,512], index: 0, kind: input, shape index: {}]   ;;  %s1797_s1 = inlined_call_operand.hbm [shape: bf16[2,512], index: 1, kind: input, shape index: {}]   ;;  %s1798_s2 = inlined_call_operand.hbm [shape: bf16[512,128], index: 2, kind: input, shape index: {}]   ;;  %s1799_s3 = inlined_call_operand.hbm [shape: bf16[512,128], index: 3, kind: input, shape index: {}]   ;;  %s1800_s4 = inlined_call_operand.hbm [shape: f32[1,128], index: 4, kind: input, shape index: {}]   ;;  %s1801_s5 = inlined_call_operand.hbm [shape: f32[128,64], index: 5, kind: input, shape index: {}]   ;;  %s1802_s6 = inlined_call_operand.hbm [shape: f32[1,64], index: 6, kind: input, shape index: {}]   ;;  %s1803_s7 = inlined_call_operand.hbm [shape: f32[1,64], index: 7, kind: input, shape index: {}]   ;;  %s1804_s8 = inlined_call_operand.<no memory space> [shape: f32[1,1], index: 8, kind: input, shape index: {}]   ;;  %s1805_s9 = inlined_call_operand.hbm [shape: f32[2,1], index: 9, kind: output, shape index: {}]  }
   0x1   :  { %v14_v0 = vstv %s1804_s8 }
   0x2   :  { %15 = vst [vmem:[#allocation2] sm:$0x1] %v14_v0 }
   0x3   :  { %16 = vsyncpa [#allocation4], 0 }
   0x4   :  { %17 = vsyncpa [#allocation7], 0 }
   0x5   :  { %18 = vsyncpa [#allocation10], 0 }
   0x6   :  { %19 = vsyncpa [#allocation13], 0 }
   0x7   :  { %20 = vsyncpa [#allocation16], 0 }
   0x8   :  { %21 = vsyncpa [#allocation5], 0 }
   0x9   :  { %26 = vsyncadd [#allocation4], 192  ;;  %s1591_s11 = smov [#allocation3]   ;;  %s1381_s15 = scalar_lea.hbm %s1796_s0, 64 }
   0xa   :  { %s27_s12 = sshll.u32 %s1591_s11, 4  ;;  %p1382_p0 = scmp.ne.s32.totalorder %s1796_s0, %s1381_s15  ;;  %s28_s12 = int_to_ptr.vmem [resolvable:$true] %s27_s12 }
   0xb   :  { %p1385_p1 = scmp.lt.u32.totalorder %s1381_s15, %s1796_s0 }
   0xd   :  { %p1387_p2 = pnand %p1385_p1, %p1382_p0 }
   0xf   :  { %1390 = shalt.err (!%p1387_p2)
}
  0x10   :  { %s1391_s19 = scalar_lea.vmem %s28_s12, 64  ;;  %s1395_s20 = scalar_lea.vmem %s28_s12, 256 }
  0x11   :  { %p1392_p3 = scmp.ne.s32.totalorder %s28_s12, %s1391_s19  ;;  %p1396_p4 = scmp.lt.s32.totalorder %s28_s12, %s28_s12 }
  0x12   :  { %p1397_p5 = scmp.lt.s32.totalorder %s1395_s20, %s1391_s19 }
  0x14   :  { %p1398_p6 = por %p1397_p5, %p1396_p4 }
  0x16   :  { %p1399_p7 = pnand %p1398_p6, %p1392_p3 }
  0x18   :  { %1402 = shalt.err (!%p1399_p7)
}
  0x19   :  { %s1592_s21 = smov 64   ;;  %s1593_s22 = smov 4  }
  0x1a   :  { %33 = dma.hbm_to_vmem [thread:$0]  %s1796_s0, 64, %s28_s12, [#allocation4], %s1592_s21, %s1592_s21, %s1593_s22  }
  0x1b   :  { %38 = vsyncadd [#allocation7], 192  ;;  %s1594_s25 = smov [#allocation6]   ;;  %s1595_s27 = smov [#allocation9]  }
  0x1c   :  { %s39_s26 = sshll.u32 %s1594_s25, 4  ;;  %s63_s28 = sshll.u32 %s1595_s27, 4  ;;  %s40_s26 = int_to_ptr.vmem [resolvable:$true] %s39_s26  ;;  %s1678_s28 = int_to_ptr.vmem [resolvable:$true] %s63_s28 }
  0x1d   :  { %s1403_s10 = scalar_lea.hbm %s1797_s1, 64 }
  0x1e   :  { %p1404_p8 = scmp.ne.s32.totalorder %s1797_s1, %s1403_s10  ;;  %p1407_p9 = scmp.lt.u32.totalorder %s1403_s10, %s1797_s1 }
  0x20   :  { %p1409_p10 = pnand %p1407_p9, %p1404_p8 }
  0x22   :  { %1412 = shalt.err (!%p1409_p10)
}
  0x23   :  { %s1413_s0 = scalar_lea.vmem %s40_s26, 64  ;;  %s1417_s12 = scalar_lea.vmem %s40_s26, 256 }
  0x24   :  { %p1414_p11 = scmp.ne.s32.totalorder %s40_s26, %s1413_s0  ;;  %p1418_p12 = scmp.lt.s32.totalorder %s40_s26, %s40_s26 }
  0x25   :  { %p1419_p13 = scmp.lt.s32.totalorder %s1417_s12, %s1413_s0 }
  0x27   :  { %p1420_p0 = por %p1419_p13, %p1418_p12 }
  0x29   :  { %p1421_p1 = pnand %p1420_p0, %p1414_p11 }
  0x2b   :  { %1424 = shalt.err (!%p1421_p1)
}
  0x2c   :  { %45 = dma.hbm_to_vmem [thread:$0]  %s1797_s1, 64, %s40_s26, [#allocation7], %s1592_s21, %s1592_s21, %s1593_s22  }
  0x2d   :  { %s1425_s19 = scalar_lea.hbm %s1799_s3, 4096 }
  0x2e   :  { %p1426_p2 = scmp.ne.s32.totalorder %s1799_s3, %s1425_s19  ;;  %p1429_p3 = scmp.lt.u32.totalorder %s1425_s19, %s1799_s3 }
  0x30   :  { %p1431_p4 = pnand %p1429_p3, %p1426_p2 }
  0x32   :  { %1434 = shalt.err (!%p1431_p4)
}
  0x33   :  { %s1435_s27 = scalar_lea.vmem %s1678_s28, 4096  ;;  %p1440_p6 = scmp.lt.s32.totalorder %s1678_s28, %s1678_s28 }
  0x34   :  { %p1436_p5 = scmp.ne.s32.totalorder %s1678_s28, %s1435_s27  ;;  %p1441_p7 = scmp.lt.s32.totalorder %s1435_s27, %s1435_s27 }
  0x36   :  { %p1442_p8 = por %p1441_p7, %p1440_p6 }
  0x38   :  { %p1443_p9 = pnand %p1442_p8, %p1436_p5 }
  0x3a   :  { %1446 = shalt.err (!%p1443_p9)
}
  0x3b   :  { %69 = dma.hbm_to_vmem [thread:$0]  %s1799_s3, 4096, %s1678_s28, [#allocation10], %s1592_s21, %s1592_s21, %s1593_s22  }
  0x3c   :  { %s1596_s29 = smov [#allocation12]   ;;  %s1447_s13 = scalar_lea.hbm %s1801_s5, 2048 }
  0x3d   :  { %s85_s30 = sshll.u32 %s1596_s29, 4  ;;  %p1448_p10 = scmp.ne.s32.totalorder %s1801_s5, %s1447_s13  ;;  %s86_s30 = int_to_ptr.vmem [resolvable:$true] %s85_s30 }
  0x3e   :  { %p1451_p11 = scmp.lt.u32.totalorder %s1447_s13, %s1801_s5 }
  0x40   :  { %p1453_p12 = pnand %p1451_p11, %p1448_p10 }
  0x42   :  { %1456 = shalt.err (!%p1453_p12)
}
  0x43   :  { %s1457_s16 = scalar_lea.vmem %s86_s30, 2048  ;;  %p1462_p0 = scmp.lt.s32.totalorder %s86_s30, %s86_s30 }
  0x44   :  { %p1458_p13 = scmp.ne.s32.totalorder %s86_s30, %s1457_s16  ;;  %p1463_p1 = scmp.lt.s32.totalorder %s1457_s16, %s1457_s16 }
  0x46   :  { %p1464_p2 = por %p1463_p1, %p1462_p0 }
  0x48   :  { %p1465_p3 = pnand %p1464_p2, %p1458_p13 }
  0x4a   :  { %1468 = shalt.err (!%p1465_p3)
}
  0x4b   :  { %s1597_s3 = smov 128   ;;  %s1598_s28 = smov 8  }
  0x4c   :  { %91 = dma.hbm_to_vmem [thread:$0]  %s1801_s5, 2048, %s86_s30, [#allocation13], %s1597_s3, %s1597_s3, %s1598_s28  }
  0x4d   :  { %s1599_s18 = smov [#allocation8]   ;;  %s1600_s20 = smov [#allocation11]  }
  0x4e   :  { %s51_s19 = sshll.u32 %s1599_s18, 4  ;;  %s76_s23 = sshll.u32 %s1600_s20, 4  ;;  %s52_s19 = int_to_ptr.vmem [resolvable:$true] %s51_s19  ;;  %s77_s23 = int_to_ptr.vmem [resolvable:$true] %s76_s23 }
  0x4f   :  { %s1469_s27 = scalar_lea.hbm %s1798_s2, 4096 }
  0x50   :  { %p1470_p4 = scmp.ne.s32.totalorder %s1798_s2, %s1469_s27  ;;  %p1473_p5 = scmp.lt.u32.totalorder %s1469_s27, %s1798_s2 }
  0x52   :  { %p1475_p6 = pnand %p1473_p5, %p1470_p4 }
  0x54   :  { %1478 = shalt.err (!%p1475_p6)
}
  0x55   :  { %s1479_s5 = scalar_lea.vmem %s52_s19, 4096  ;;  %p1484_p8 = scmp.lt.s32.totalorder %s52_s19, %s52_s19 }
  0x56   :  { %p1480_p7 = scmp.ne.s32.totalorder %s52_s19, %s1479_s5  ;;  %p1485_p9 = scmp.lt.s32.totalorder %s1479_s5, %s1479_s5 }
  0x58   :  { %p1486_p10 = por %p1485_p9, %p1484_p8 }
  0x5a   :  { %p1487_p11 = pnand %p1486_p10, %p1480_p7 }
  0x5c   :  { %1490 = shalt.err (!%p1487_p11)
}
  0x5d   :  { %57 = dma.hbm_to_vmem [thread:$0]  %s1798_s2, 4096, %s52_s19, [#allocation7], %s1592_s21, %s1592_s21, %s1593_s22  }
  0x5e   :  { %s1491_s15 = scalar_lea.hbm %s1800_s4, 16 }
  0x5f   :  { %p1492_p12 = scmp.ne.s32.totalorder %s1800_s4, %s1491_s15  ;;  %p1495_p13 = scmp.lt.u32.totalorder %s1491_s15, %s1800_s4 }
  0x61   :  { %p1497_p0 = pnand %p1495_p13, %p1492_p12 }
  0x63   :  { %1500 = shalt.err (!%p1497_p0)
}
  0x64   :  { %s1501_s28 = scalar_lea.vmem %s77_s23, 16  ;;  %s1505_s17 = scalar_lea.vmem %s77_s23, 32 }
  0x65   :  { %p1502_p1 = scmp.ne.s32.totalorder %s77_s23, %s1501_s28  ;;  %p1506_p2 = scmp.lt.s32.totalorder %s77_s23, %s77_s23 }
  0x66   :  { %p1507_p3 = scmp.lt.s32.totalorder %s1505_s17, %s1501_s28 }
  0x68   :  { %p1508_p4 = por %p1507_p3, %p1506_p2 }
  0x6a   :  { %p1509_p5 = pnand %p1508_p4, %p1502_p1 }
  0x6c   :  { %1512 = shalt.err (!%p1509_p5)
}
  0x6d   :  { %79 = dma.hbm_to_vmem [thread:$0]  %s1800_s4, 16, %s77_s23, [#allocation10]  }
  0x6e   :  { %s1601_s22 = smov [#allocation14]   ;;  %s1602_s18 = smov [#allocation15]  }
  0x6f   :  { %s98_s8 = sshll.u32 %s1601_s22, 4  ;;  %s108_s19 = sshll.u32 %s1602_s18, 4  ;;  %s99_s8 = int_to_ptr.vmem [resolvable:$true] %s98_s8  ;;  %s109_s19 = int_to_ptr.vmem [resolvable:$true] %s108_s19 }
  0x70   :  { %s1513_s25 = scalar_lea.hbm %s1802_s6, 16 }
  0x71   :  { %p1514_p6 = scmp.ne.s32.totalorder %s1802_s6, %s1513_s25  ;;  %p1517_p7 = scmp.lt.u32.totalorder %s1513_s25, %s1802_s6 }
  0x73   :  { %p1519_p8 = pnand %p1517_p7, %p1514_p6 }
  0x75   :  { %1522 = shalt.err (!%p1519_p8)
}
  0x76   :  { %s1523_s4 = scalar_lea.vmem %s99_s8, 16  ;;  %s1527_s23 = scalar_lea.vmem %s99_s8, 32 }
  0x77   :  { %p1524_p9 = scmp.ne.s32.totalorder %s99_s8, %s1523_s4  ;;  %p1528_p10 = scmp.lt.s32.totalorder %s99_s8, %s99_s8 }
  0x78   :  { %p1529_p11 = scmp.lt.s32.totalorder %s1527_s23, %s1523_s4 }
  0x7a   :  { %p1530_p12 = por %p1529_p11, %p1528_p10 }
  0x7c   :  { %p1531_p13 = pnand %p1530_p12, %p1524_p9 }
  0x7e   :  { %1534 = shalt.err (!%p1531_p13)
}
  0x7f   :  { %101 = dma.hbm_to_vmem [thread:$0]  %s1802_s6, 16, %s99_s8, [#allocation13]  }
  0x80   :  { %s1535_s13 = scalar_lea.hbm %s1803_s7, 16 }
  0x81   :  { %p1536_p0 = scmp.ne.s32.totalorder %s1803_s7, %s1535_s13  ;;  %p1539_p1 = scmp.lt.u32.totalorder %s1535_s13, %s1803_s7 }
  0x83   :  { %p1541_p2 = pnand %p1539_p1, %p1536_p0 }
  0x85   :  { %1544 = shalt.err (!%p1541_p2)
}
  0x86   :  { %s1545_s16 = scalar_lea.vmem %s109_s19, 16  ;;  %s1549_s3 = scalar_lea.vmem %s109_s19, 32 }
  0x87   :  { %p1546_p3 = scmp.ne.s32.totalorder %s109_s19, %s1545_s16  ;;  %p1550_p4 = scmp.lt.s32.totalorder %s109_s19, %s109_s19 }
  0x88   :  { %p1551_p5 = scmp.lt.s32.totalorder %s1549_s3, %s1545_s16 }
  0x8a   :  { %p1552_p6 = por %p1551_p5, %p1550_p4 }
  0x8c   :  { %p1553_p7 = pnand %p1552_p6, %p1546_p3 }
  0x8e   :  { %1556 = shalt.err (!%p1553_p7)
}
  0x8f   :  { %111 = dma.hbm_to_vmem [thread:$0]  %s1803_s7, 16, %s109_s19, [#allocation16]  }
  0x90   :  { %1579 = dma.done.wait [#allocation4], 256  }
  0x91   :  { %1580 = vsyncadd [#allocation4], 4294967040 }
  0x92   :  { %1581 = dma.done.wait [#allocation7], 4352  }
  0x93   :  { %1582 = vsyncadd [#allocation7], 4294962944 }
  0x94   :  { %1583 = dma.done.wait [#allocation10], 4112  }
  0x95   :  { %1584 = vsyncadd [#allocation10], 4294963184 }
  0x96   :  { %1585 = dma.done.wait [#allocation13], 2064  }
  0x97   :  { %1586 = vsyncadd [#allocation13], 4294965232 }
  0x98   :  { %1587 = dma.done.wait [#allocation16], 16  }
  0x99   :  { %1588 = vsyncadd [#allocation16], 4294967280  ;;  %v1305_v1 = vld [vmem:[#allocation9 + $0x40] sm:$0xff]   ;;  %v1309_v5 = vld [vmem:[#allocation9 + $0x48] sm:$0xff]   ;;  %v1603_v25 = vmov 1966171168   ;;  %v284_v27 = vlaneseq }
  0x9a   :  { %v1306_v2 = vld [vmem:[#allocation9 + $0xc0] sm:$0xff]   ;;  %1122 = vmatprep.subr.bf16.mxu0 %v1305_v1  ;;  %v1310_v6 = vld [vmem:[#allocation9 + $0xc8] sm:$0xff]   ;;  %v1313_v9 = vld [vmem:[#allocation9 + $0x50] sm:$0xff]   ;;  %v282_v26 = vunpack.c.l.s4 %v1603_v25  ;;  %vm1605_vm0 = vmmov 0   ;;  %vm1014_vm1 = vcmask 523264   ;;  %vm1031_vm2 = vcmask 7168  }
  0x9b   :  { %v1307_v3 = vld [vmem:[#allocation9] sm:$0xff]   ;;  %1144 = vmatprep.subr.bf16.mxu1 %v1306_v2  ;;  %v1311_v7 = vld [vmem:[#allocation9 + $0x8] sm:$0xff]   ;;  %v1314_v10 = vld [vmem:[#allocation9 + $0xd0] sm:$0xff]   ;;  %v285_v33 = vshrl.u32 %v284_v27, 7 }
  0x9c   :  { %v1308_v4 = vld [vmem:[#allocation9 + $0x80] sm:$0xff]   ;;  %1123 = vmatpush3.bf16.msra.mxu0 %v1307_v3  ;;  %v1312_v8 = vld [vmem:[#allocation9 + $0x88] sm:$0xff]   ;;  %v1315_v11 = vld [vmem:[#allocation9 + $0x10] sm:$0xff]   ;;  %v283_v32 = vunpack.c.0.s8 %v282_v26  ;;  %v1604_v26 = vmov 0.0|0.0  }
  0x9d   :  { %1145 = vmatpush3.bf16.msra.mxu1 %v1308_v4  ;;  %1124 = vmatprep.subr.bf16.mxu0 %v1309_v5  ;;  %v1316_v12 = vld [vmem:[#allocation9 + $0x90] sm:$0xff]   ;;  %v1317_v13 = vld [vmem:[#allocation9 + $0x58] sm:$0xff]   ;;  %v1321_v17 = vld [vmem:[#allocation9 + $0x60] sm:$0xff]  }
  0x9e   :  { %1146 = vmatprep.subr.bf16.mxu1 %v1310_v6  ;;  %v1318_v14 = vld [vmem:[#allocation9 + $0xd8] sm:$0xff]   ;;  %v1322_v18 = vld [vmem:[#allocation9 + $0xe0] sm:$0xff]   ;;  %v1325_v21 = vld [vmem:[#allocation9 + $0x68] sm:$0xff]   ;;  %v1778_v38 = vsub.s32 %v283_v32, %v285_v33 }
  0x9f   :  { %v1319_v15 = vld [vmem:[#allocation9 + $0x18] sm:$0xff]   ;;  %v1323_v19 = vld [vmem:[#allocation9 + $0x20] sm:$0xff]   ;;  %v1326_v22 = vld [vmem:[#allocation9 + $0xe8] sm:$0xff]  }
  0xa0   :  { %1125 = vmatpush3.bf16.msra.mxu0 %v1311_v7  ;;  %v1320_v16 = vld [vmem:[#allocation9 + $0x98] sm:$0xff]   ;;  %v1324_v20 = vld [vmem:[#allocation9 + $0xa0] sm:$0xff]   ;;  %v1327_v23 = vld [vmem:[#allocation9 + $0x28] sm:$0xff]  }
  0xa1   :  { %1147 = vmatpush3.bf16.msra.mxu1 %v1312_v8  ;;  %1126 = vmatprep.subr.bf16.mxu0 %v1313_v9  ;;  %v1328_v24 = vld [vmem:[#allocation9 + $0xa8] sm:$0xff]   ;;  %v1329_v28 = vld [vmem:[#allocation9 + $0x70] sm:$0xff]   ;;  %v1333_v34 = vld [vmem:[#allocation9 + $0x78] sm:$0xff]  }
  0xa2   :  { %1148 = vmatprep.subr.bf16.mxu1 %v1314_v10  ;;  %v1330_v29 = vld [vmem:[#allocation9 + $0xf0] sm:$0xff]   ;;  %v1334_v35 = vld [vmem:[#allocation9 + $0xf8] sm:$0xff]   ;;  %v1339_v41 = vld [vmem:[#allocation8 + $0x40] sm:$0xff]  }
  0xa3   :  { %v1331_v30 = vld [vmem:[#allocation9 + $0x30] sm:$0xff]   ;;  %v1335_v36 = vld [vmem:[#allocation9 + $0x38] sm:$0xff]   ;;  %v1340_v42 = vld [vmem:[#allocation8 + $0xc0] sm:$0xff]  }
  0xa4   :  { %1127 = vmatpush3.bf16.msra.mxu0 %v1315_v11  ;;  %v1332_v31 = vld [vmem:[#allocation9 + $0xb0] sm:$0xff]   ;;  %v1336_v37 = vld [vmem:[#allocation9 + $0xb8] sm:$0xff]   ;;  %v1341_v45 = vld [vmem:[#allocation8] sm:$0xff]  }
  0xa5   :  { %1149 = vmatpush3.bf16.msra.mxu1 %v1316_v12  ;;  %1128 = vmatprep.subr.bf16.mxu0 %v1317_v13  ;;  %v1377_v39 = vld.sshfl [vmem:[#allocation6] sm:$0xff pattern:$0x75316420]  ;;  %v1378_v40 = vld.sshfl [vmem:[#allocation6 + $0x8] sm:$0xff pattern:$0x75316420] }
  0xa6   :  { %1150 = vmatprep.subr.bf16.mxu1 %v1318_v14  ;;  %v296_v43 = vcombine.high %v1377_v39, %v1378_v40  ;;  %v295_v44 = vcombine.low %v1377_v39, %v1378_v40  ;;  %v1342_v48 = vld [vmem:[#allocation8 + $0x80] sm:$0xff]   ;;  %v1343_v49 = vld [vmem:[#allocation8 + $0x48] sm:$0xff]   ;;  %v1347_v55 = vld [vmem:[#allocation8 + $0x50] sm:$0xff]  }
  0xa7   :  { %v1344_v52 = vld [vmem:[#allocation8 + $0xc8] sm:$0xff]   ;;  %v1348_v56 = vld [vmem:[#allocation8 + $0xd0] sm:$0xff]   ;;  %v1351_v59 = vld [vmem:[#allocation8 + $0x58] sm:$0xff]  }
  0xa8   :  { %1129 = vmatpush3.bf16.msra.mxu0 %v1319_v15  ;;  %v310_v46 = vrot.slane %v296_v43, %v1778_v38  ;;  %v303_v47 = vrot.slane %v295_v44, %v1778_v38  ;;  %v1345_v53 = vld [vmem:[#allocation8 + $0x8] sm:$0xff]   ;;  %v1349_v57 = vld [vmem:[#allocation8 + $0x10] sm:$0xff]   ;;  %v1352_v60 = vld [vmem:[#allocation8 + $0xd8] sm:$0xff]  }
  0xa9   :  { %1151 = vmatpush3.bf16.msra.mxu1 %v1320_v16  ;;  %1130 = vmatprep.subr.bf16.mxu0 %v1321_v17  ;;  %v1346_v54 = vld [vmem:[#allocation8 + $0x88] sm:$0xff]   ;;  %v1350_v58 = vld [vmem:[#allocation8 + $0x90] sm:$0xff]   ;;  %v1353_v61 = vld [vmem:[#allocation8 + $0x18] sm:$0xff]  }
  0xaa   :  { %1152 = vmatprep.subr.bf16.mxu1 %v1322_v18  ;;  %541 = vmatprep.mubr.bf16.mxu0 %v310_v46  ;;  %v312_v50 = vcombine.high %v310_v46, %v310_v46  ;;  %v311_v51 = vcombine.high %v303_v47, %v303_v47  ;;  %v1354_v62 = vld [vmem:[#allocation8 + $0x98] sm:$0xff]   ;;  %v1355_v63 = vld [vmem:[#allocation8 + $0x60] sm:$0xff]   ;;  %v1359_v3 = vld [vmem:[#allocation8 + $0x68] sm:$0xff]  }
  0xab   :  { %v1356_v0 = vld [vmem:[#allocation8 + $0xe0] sm:$0xff]   ;;  %v1360_v4 = vld [vmem:[#allocation8 + $0xe8] sm:$0xff]   ;;  %v1363_v7 = vld [vmem:[#allocation8 + $0x70] sm:$0xff]  }
  0xac   :  { %1131 = vmatpush3.bf16.msra.mxu0 %v1323_v19  ;;  %581 = vmatprep.mubr.bf16.mxu1 %v312_v50  ;;  %v1357_v1 = vld [vmem:[#allocation8 + $0x20] sm:$0xff]   ;;  %v1361_v5 = vld [vmem:[#allocation8 + $0x28] sm:$0xff]   ;;  %v1364_v8 = vld [vmem:[#allocation8 + $0xf0] sm:$0xff]  }
  0xad   :  { %1153 = vmatpush3.bf16.msra.mxu1 %v1324_v20  ;;  %1132 = vmatprep.subr.bf16.mxu0 %v1325_v21  ;;  %v1358_v2 = vld [vmem:[#allocation8 + $0xa0] sm:$0xff]   ;;  %v1362_v6 = vld [vmem:[#allocation8 + $0xa8] sm:$0xff]   ;;  %v1365_v9 = vld [vmem:[#allocation8 + $0x30] sm:$0xff]  }
  0xae   :  { %1154 = vmatprep.subr.bf16.mxu1 %v1326_v22  ;;  %v1366_v10 = vld [vmem:[#allocation8 + $0xb0] sm:$0xff]   ;;  %v1367_v11 = vld [vmem:[#allocation8 + $0x78] sm:$0xff]   ;;  %v1379_v14 = vld.sshfl [vmem:[#allocation3] sm:$0xff pattern:$0x75316420] }
  0xaf   :  { %v1368_v12 = vld [vmem:[#allocation8 + $0xf8] sm:$0xff]   ;;  %v1380_v15 = vld.sshfl [vmem:[#allocation3 + $0x8] sm:$0xff pattern:$0x75316420] }
  0xb0   :  { %1133 = vmatpush3.bf16.msra.mxu0 %v1327_v23  ;;  %v1369_v13 = vld [vmem:[#allocation8 + $0x38] sm:$0xff]   ;;  %v610_v17 = vcombine.high %v1379_v14, %v1380_v15  ;;  %v609_v18 = vcombine.low %v1379_v14, %v1380_v15  ;;  %v912_v23 = vld [vmem:[#allocation12] sm:$0xff]  ;;  %v925_v43 = vld [vmem:[#allocation12 + $0x68] sm:$0xff] }
  0xb1   :  { %1155 = vmatpush3.bf16.msra.mxu1 %v1328_v24  ;;  %1134 = vmatprep.subr.bf16.mxu0 %v1329_v28  ;;  %v1370_v16 = vld [vmem:[#allocation8 + $0xb8] sm:$0xff]   ;;  %v913_v24 = vld [vmem:[#allocation12 + $0x8] sm:$0xff]  ;;  %v1120_v15 = vld [vmem:[#allocation15] ss:$0 sm:$0xff] }
  0xb2   :  { %1156 = vmatprep.subr.bf16.mxu1 %v1330_v29  ;;  %v624_v19 = vrot.slane %v610_v17, %v1778_v38  ;;  %v617_v20 = vrot.slane %v609_v18, %v1778_v38  ;;  %v914_v25 = vld [vmem:[#allocation12 + $0x10] sm:$0xff]  ;;  %v1263_v27 = vpack.c.bf16 %v913_v24, %v912_v23  ;;  %v915_v28 = vld [vmem:[#allocation12 + $0x18] sm:$0xff] }
  0xb3   :  { %v1266_v29 = vpack.c.bf16 %v915_v28, %v914_v25  ;;  %v918_v33 = vld [vmem:[#allocation12 + $0x30] sm:$0xff]  ;;  %v923_v40 = vld [vmem:[#allocation12 + $0x58] sm:$0xff] }
  0xb4   :  { %1135 = vmatpush3.bf16.msra.mxu0 %v1331_v30  ;;  %v626_v21 = vcombine.high %v624_v19, %v624_v19  ;;  %v625_v22 = vcombine.high %v617_v20, %v617_v20  ;;  %v916_v30 = vld [vmem:[#allocation12 + $0x20] sm:$0xff]  ;;  %v922_v39 = vld [vmem:[#allocation12 + $0x50] sm:$0xff]  ;;  %v927_v46 = vld [vmem:[#allocation12 + $0x78] sm:$0xff] }
  0xb5   :  { %1157 = vmatpush3.bf16.msra.mxu1 %v1332_v31  ;;  %1136 = vmatprep.subr.bf16.mxu0 %v1333_v34  ;;  %v917_v31 = vld [vmem:[#allocation12 + $0x28] sm:$0xff]  ;;  %v919_v34 = vld [vmem:[#allocation12 + $0x38] sm:$0xff] }
  0xb6   :  { %1158 = vmatprep.subr.bf16.mxu1 %v1334_v35  ;;  %v1269_v32 = vpack.c.bf16 %v917_v31, %v916_v30  ;;  %v1272_v35 = vpack.c.bf16 %v919_v34, %v918_v33 }
  0xb8   :  { %1137 = vmatpush3.bf16.msra.mxu0 %v1335_v36  ;;  %v920_v36 = vld [vmem:[#allocation12 + $0x40] sm:$0xff] }
  0xb9   :  { %1159 = vmatpush3.bf16.msra.mxu1 %v1336_v37  ;;  %1166 = vmatprep.subr.bf16.mxu0 %v1339_v41  ;;  %v921_v37 = vld [vmem:[#allocation12 + $0x48] sm:$0xff]  ;;  %v1278_v41 = vpack.c.bf16 %v923_v40, %v922_v39 }
  0xba   :  { %1188 = vmatprep.subr.bf16.mxu1 %v1340_v42  ;;  %v1275_v38 = vpack.c.bf16 %v921_v37, %v920_v36  ;;  %v924_v42 = vld [vmem:[#allocation12 + $0x60] sm:$0xff] }
  0xbb   :  { %542 = vmatmul.mubr.bf16.vlgmr.msra.gmra.mrb[0].mxu0 %v303_v47  ;;  %v1281_v44 = vpack.c.bf16 %v925_v43, %v924_v42 }
  0xbc   :  { %1167 = vmatpush3.bf16.msra.mxu0 %v1341_v45  ;;  %582 = vmatmul.mubr.bf16.vlgmr.msra.gmra.mrb[0].mxu1 %v311_v51  ;;  %v926_v45 = vld [vmem:[#allocation12 + $0x70] sm:$0xff] }
  0xbd   :  { %1168 = vmatprep.subr.bf16.mxu0 %v1343_v49  ;;  %1189 = vmatpush3.bf16.msra.mxu1 %v1342_v48  ;;  %v1284_v47 = vpack.c.bf16 %v927_v46, %v926_v45  ;;  %v1606_v48 = vmov 0.0  }
  0xbe   :  { %1190 = vmatprep.subr.bf16.mxu1 %v1344_v52  ;;  %855 = vmatprep.mubr.bf16.mxu0 %v624_v19  ;;  %v1121_v19 = vld [vmem:[#allocation2] ss:$0 sm:$0xff] }
  0xbf   :  { %895 = vmatprep.mubr.bf16.mxu1 %v626_v21 }
  0xc0   :  { %1169 = vmatpush3.bf16.msra.mxu0 %v1345_v53 }
  0xc1   :  { %1170 = vmatprep.subr.bf16.mxu0 %v1347_v55  ;;  %1191 = vmatpush3.bf16.msra.mxu1 %v1346_v54 }
  0xc2   :  { %1192 = vmatprep.subr.bf16.mxu1 %v1348_v56 }
  0xc4   :  { %1171 = vmatpush3.bf16.msra.mxu0 %v1349_v57 }
  0xc5   :  { %1172 = vmatprep.subr.bf16.mxu0 %v1351_v59  ;;  %1193 = vmatpush3.bf16.msra.mxu1 %v1350_v58 }
  0xc6   :  { %1194 = vmatprep.subr.bf16.mxu1 %v1352_v60 }
  0xc8   :  { %1173 = vmatpush3.bf16.msra.mxu0 %v1353_v61 }
  0xc9   :  { %1174 = vmatprep.subr.bf16.mxu0 %v1355_v63  ;;  %1195 = vmatpush3.bf16.msra.mxu1 %v1354_v62 }
  0xca   :  { %1196 = vmatprep.subr.bf16.mxu1 %v1356_v0 }
  0xcc   :  { %1175 = vmatpush3.bf16.msra.mxu0 %v1357_v1 }
  0xcd   :  { %1176 = vmatprep.subr.bf16.mxu0 %v1359_v3  ;;  %1197 = vmatpush3.bf16.msra.mxu1 %v1358_v2 }
  0xce   :  { %1198 = vmatprep.subr.bf16.mxu1 %v1360_v4 }
  0xd0   :  { %1177 = vmatpush3.bf16.msra.mxu0 %v1361_v5 }
  0xd1   :  { %1178 = vmatprep.subr.bf16.mxu0 %v1363_v7  ;;  %1199 = vmatpush3.bf16.msra.mxu1 %v1362_v6  ;;  %v1118_v6 = vld [vmem:[#allocation11] ss:$0 sm:$0xff] }
  0xd2   :  { %1200 = vmatprep.subr.bf16.mxu1 %v1364_v8 }
  0xd4   :  { %1179 = vmatpush3.bf16.msra.mxu0 %v1365_v9 }
  0xd5   :  { %1180 = vmatprep.subr.bf16.mxu0 %v1367_v11  ;;  %1201 = vmatpush3.bf16.msra.mxu1 %v1366_v10  ;;  %v1119_v11 = vld [vmem:[#allocation14] ss:$0 sm:$0xff] }
  0xd6   :  { %1202 = vmatprep.subr.bf16.mxu1 %v1368_v12 }
  0xd8   :  { %1181 = vmatpush3.bf16.msra.mxu0 %v1369_v13 }
  0xd9   :  { %1203 = vmatpush3.bf16.msra.mxu1 %v1370_v16  ;;  %1262 = vmatprep.subr.bf16.mxu0 %v1604_v26 }
  0xdb   :  { %856 = vmatmul.mubr.bf16.vlgmr.msra.gmra.mrb[4].mxu0 %v617_v20 }
  0xdc   :  { %896 = vmatmul.mubr.bf16.vlgmr.msra.gmra.mrb[4].mxu1 %v625_v22  ;;  %1264 = vmatpush3.bf16.msra.mxu0 %v1263_v27 }
  0xdd   :  { %1265 = vmatprep.subr.bf16.mxu0 %v1604_v26  ;;  %1259 = vmatprep.mubr.msk.f32.mxu0 %vm1605_vm0, %v1606_v48 }
  0xe0   :  { %1267 = vmatpush3.bf16.msra.mxu0 %v1266_v29 }
  0xe1   :  { %1268 = vmatprep.subr.bf16.mxu0 %v1604_v26 }
  0xe4   :  { %1270 = vmatpush3.bf16.msra.mxu0 %v1269_v32 }
  0xe5   :  { %1271 = vmatprep.subr.bf16.mxu0 %v1604_v26 }
  0xe8   :  { %1273 = vmatpush3.bf16.msra.mxu0 %v1272_v35 }
  0xe9   :  { %1274 = vmatprep.subr.bf16.mxu0 %v1604_v26 }
  0xec   :  { %1276 = vmatpush3.bf16.msra.mxu0 %v1275_v38 }
  0xed   :  { %1277 = vmatprep.subr.bf16.mxu0 %v1604_v26 }
  0xf0   :  { %1279 = vmatpush3.bf16.msra.mxu0 %v1278_v41 }
  0xf1   :  { %1280 = vmatprep.subr.bf16.mxu0 %v1604_v26 }
  0xf4   :  { %1282 = vmatpush3.bf16.msra.mxu0 %v1281_v44 }
  0xf5   :  { %1283 = vmatprep.subr.bf16.mxu0 %v1604_v26 }
  0xf8   :  { %1285 = vmatpush3.bf16.msra.mxu0 %v1284_v47 }
 0x18e   :  { %v1138_v49 = vpop.f32.mrb[0].mxu0 }
 0x18f   :  { %v1139_v50 = vpop.f32.mrb[1].mxu0  ;;  %v1160_v51 = vpop.f32.mrb[0].mxu1 }
 0x190   :  { %v1140_v52 = vadd.f32 %v1139_v50, %v1138_v49  ;;  %v1141_v53 = vpop.f32.mrb[2].mxu0  ;;  %v1161_v54 = vpop.f32.mrb[1].mxu1 }
 0x191   :  { %v1142_v55 = vpop.f32.mrb[3].mxu0  ;;  %v1162_v56 = vadd.f32 %v1161_v54, %v1160_v51  ;;  %v1163_v57 = vpop.f32.mrb[2].mxu1 }
 0x192   :  { %v1164_v58 = vpop.f32.mrb[3].mxu1 }
 0x193   :  { %v584_v59 = vadd.f32 %v1162_v56, %v1140_v52 }
 0x1ae   :  { %v1182_v60 = vpop.f32.mrb[4].mxu0 }
 0x1af   :  { %v1183_v61 = vpop.f32.mrb[5].mxu0  ;;  %v1204_v62 = vpop.f32.mrb[4].mxu1 }
 0x1b0   :  { %v1184_v63 = vadd.f32 %v1183_v61, %v1182_v60  ;;  %v1185_v0 = vpop.f32.mrb[6].mxu0  ;;  %v1205_v1 = vpop.f32.mrb[5].mxu1 }
 0x1b1   :  { %v1186_v2 = vpop.f32.mrb[7].mxu0  ;;  %v1206_v4 = vadd.f32 %v1205_v1, %v1204_v62  ;;  %v1207_v5 = vpop.f32.mrb[6].mxu1 }
 0x1b2   :  { %v858_v3 = vadd.f32 %v1184_v63, %v584_v59  ;;  %v1208_v7 = vpop.f32.mrb[7].mxu1 }
 0x1b4   :  { %v898_v8 = vadd.f32 %v1206_v4, %v858_v3 }
 0x1b6   :  { %v910_v9 = vadd.f32 %v1118_v6, %v898_v8 }
 0x1b8   :  { %v911_v10 = vmax.f32 %v910_v9, 0.0 }
 0x1ba   :  { %1260 = vmatmul.mubr.f32.vlgmr.msra.gmra.mrb[8].mxu0 %v911_v10 }
 0x28d   :  { %v1001_v12 = vpop.f32.mrb[8].mxu0 }
 0x28e   :  { %v1002_v13 = vadd.f32 %v1119_v11, %v1001_v12  ;;  %v1261_v14 = vpop.f32.mrb[9].mxu0 }
 0x290   :  { %v1005_v16 = vmax.f32 %v1002_v13, 0.0 }
 0x292   :  { %v1013_v17 = vmul.f32 %v1120_v15, %v1005_v16 }
 0x294   :  { %v1015_v18 = vsel %vm1014_vm1, %v1013_v17, 0.0 }
 0x295   :  { %1016 = vadd.xlane.f32.xlu0 %v1015_v18 }
 0x322   :  { %v1017_v20 = vpop.xlane.xlu0 %1016 }
 0x323   :  { %v1025_v21 = vadd.f32 %v1121_v19, %v1017_v20 }
 0x325   :  { %v1026_v22 = vsub.f32 0.0, %v1025_v21 }
 0x327   :  { %v1027_v23 = vmul.f32 1.442695, %v1026_v22 }
 0x329   :  { %1373 = vpow2.f32 %v1027_v23 }
 0x333   :  { %v1374_v24 = vpop.eup %1373 }
 0x334   :  { %v1029_v25 = vadd.f32 1.0, %v1374_v24 }
 0x336   :  { %1375 = vrcp.f32 %v1029_v25 }
 0x340   :  { %v1376_v26 = vpop.eup %1375 }
 0x341   :  { %1032 = vst.msk [vmem:[#allocation17] sm:$0xff] %vm1031_vm2, %v1376_v26 }
 0x342   :  { %1037 = vsyncadd [#allocation5], 96  ;;  %s1607_s7 = smov [#allocation17]  }
 0x343   :  { %s1038_s17 = sshll.u32 %s1607_s7, 4  ;;  %s1039_s17 = int_to_ptr.vmem [resolvable:$true] %s1038_s17 }
 0x344   :  { %s1557_s2 = scalar_lea.vmem %s1039_s17, 32  ;;  %s1561_s21 = scalar_lea.vmem %s1039_s17, 128 }
 0x345   :  { %p1558_p8 = scmp.ne.s32.totalorder %s1039_s17, %s1557_s2  ;;  %p1562_p9 = scmp.lt.s32.totalorder %s1039_s17, %s1039_s17 }
 0x346   :  { %p1563_p10 = scmp.lt.s32.totalorder %s1561_s21, %s1557_s2 }
 0x348   :  { %p1564_p11 = por %p1563_p10, %p1562_p9 }
 0x34a   :  { %p1565_p12 = pnand %p1564_p11, %p1558_p8 }
 0x34c   :  { %1568 = shalt.err (!%p1565_p12)
}
 0x34d   :  { %s1569_s18 = scalar_lea.hbm %s1805_s9, 32 }
 0x34e   :  { %p1570_p13 = scmp.ne.s32.totalorder %s1805_s9, %s1569_s18  ;;  %p1573_p0 = scmp.lt.u32.totalorder %s1569_s18, %s1805_s9 }
 0x350   :  { %p1575_p1 = pnand %p1573_p0, %p1570_p13 }
 0x352   :  { %1578 = shalt.err (!%p1575_p1)
}
 0x353   :  { %s1608_s27 = smov 32   ;;  %s1609_s1 = smov 2  }
 0x354   :  { %1044 = dma.vmem_to_hbm [thread:$0]  %s1039_s17, 32, %s1805_s9, [#allocation5], %s1608_s27, %s1608_s27, %s1609_s1  }
 0x355   :  { %1589 = dma.done.wait [#allocation5], 128  }
 0x356   :  { %1590 = vsyncadd [#allocation5], 4294967168 }
 0x357   :  { %1048 = vsyncpa [#allocation4], 1 }
 0x358   :  { %1049 = vsyncpa [#allocation7], 1 }
 0x359   :  { %1050 = vsyncpa [#allocation10], 1 }
 0x35a   :  { %1051 = vsyncpa [#allocation13], 1 }
 0x35b   :  { %1052 = vsyncpa [#allocation16], 1 }
 0x35c   :  { %1053 = vsyncpa [#allocation5], 1 }

</bundles_post_ra>
